<compile_context>
chip_gen: v6e
topology: v6e:2x2x1
jax: 0.10.0
libtpu: 0.0.40
codegen_flags: <defaults>
</compile_context>

<pallas_src>
import jax
import jax.numpy as jnp
import numpy as np
from jax.experimental import pallas as pl
from jax.experimental.pallas import tpu as pltpu

N_PAD = 128  # lane width / minimum legal square MXU tile; do not enlarge
SLAB = 8     # one f32 vreg of sublanes; holds the live 5x5 block


def mm_chain_kernel(x_ref, o_ref, slab_ref):
    n = x_ref.shape[0]

    # One-time in-kernel zero-pad of the (n, n) input into an (8, 128) slab.
    slab_ref[...] = jnp.zeros_like(slab_ref)
    slab_ref[0:n, 0:n] = x_ref[...]
    v_slab = slab_ref[...]                       # (8, 128); rows/cols >= n are 0

    # Hoisted once: rows 8..127 of the padded matrix are provably zero.
    zeros_tail = jnp.zeros((N_PAD - SLAB, N_PAD), jnp.float32)

    # v = x @ x, then 10x v = v @ v  (11 dependent squarings == x ** 2048).
    # LHS is the live (8,128) slab; RHS is the full (128,128) padded matrix,
    # rebuilt register-resident from slab + zero tail each step (exact).
    for _ in range(11):
        v_full = jnp.concatenate([v_slab, zeros_tail], axis=0)   # (128, 128)
        v_slab = jnp.dot(
            v_slab,
            v_full,
            preferred_element_type=jnp.float32,
            precision=jax.lax.Precision.HIGHEST,
        )

    # Fused output slice: single masked store of the live (n, n) block.
    o_ref[...] = v_slab[0:n, 0:n]


def mm_chain(x1):
    n = x1.shape[0]
    assert x1.shape == (n, n)
    return pl.pallas_call(
        mm_chain_kernel,
        out_shape=jax.ShapeDtypeStruct((n, n), jnp.float32),
        in_specs=[pl.BlockSpec((n, n), lambda: (0, 0))],
        out_specs=pl.BlockSpec((n, n), lambda: (0, 0)),
        scratch_shapes=[pltpu.VMEM((SLAB, N_PAD), jnp.float32)],
        cost_estimate=pl.CostEstimate(
            flops=11 * 2 * SLAB * N_PAD * N_PAD,
            transcendentals=0,
            bytes_accessed=2 * n * n * 4,
        ),
    )(x1.astype(jnp.float32))


def reference(x1):
    hi = jax.lax.Precision.HIGHEST
    v = jnp.dot(x1, x1, precision=hi)
    for _ in range(10):
        v = jnp.dot(v, v, precision=hi)
    return v


if __name__ == "__main__":
    key = jax.random.PRNGKey(0)
    # torch.randn(5, 5) equivalent, rescaled so the spectral radius is ~1 and
    # the 2048-th matrix power stays finite and meaningful in float32 (raw
    # randn would overflow/underflow in PyTorch too).
    a = jax.random.normal(key, (5, 5), dtype=jnp.float32)
    rho = np.max(np.abs(np.linalg.eigvals(np.asarray(a, dtype=np.float64))))
    x1 = (a / jnp.float32(rho)).astype(jnp.float32)

    out = jax.block_until_ready(mm_chain(x1))
    ref = jax.block_until_ready(reference(x1))

    assert out.shape == (5, 5)
    scale = float(jnp.max(jnp.abs(ref)))
    # Purely scale-relative tolerance: repeated squaring amplifies per-step
    # f32 rounding by ~2^11, so allow ~0.2% of the result scale.
    assert jnp.allclose(out, ref, rtol=1e-2, atol=2e-3 * scale), (out, ref)

    print("KERNEL_OK")
</pallas_src>

<mosaic_0001>
module attributes {stable_mosaic.version = 11 : i64} {
  func.func @mm_chain_kernel(%arg0: memref<5x5xf32, #tpu.memory_space<vmem>>, %arg1: memref<5x5xf32, #tpu.memory_space<vmem>>, %arg2: memref<8x128xf32, #tpu.memory_space<vmem>>) attributes {dimension_semantics = [], scalar_prefetch = 0 : i64, scratch_operands = 1 : i64, tpu.core_type = #tpu.core_type<tc>} {
    %cst = arith.constant 0.000000e+00 : f32
    %0 = vector.broadcast %cst : f32 to vector<8x128xf32>
    %c0 = arith.constant 0 : index
    %c0_0 = arith.constant 0 : index
    %1 = vector.load %arg2[%c0, %c0_0] : memref<8x128xf32, #tpu.memory_space<vmem>>, vector<8x128xf32>
    tpu.vector_store %arg2[%c0, %c0_0], %0 {strides = array<i32>} : memref<8x128xf32, #tpu.memory_space<vmem>>, vector<8x128xf32>,
    %c0_1 = arith.constant 0 : index
    %c0_2 = arith.constant 0 : index
    %2 = vector.load %arg0[%c0_1, %c0_2] : memref<5x5xf32, #tpu.memory_space<vmem>>, vector<5x5xf32>
    %c0_3 = arith.constant 0 : index
    %c0_4 = arith.constant 0 : index
    %3 = vector.load %arg2[%c0_3, %c0_4] : memref<8x128xf32, #tpu.memory_space<vmem>>, vector<5x5xf32>
    tpu.vector_store %arg2[%c0_3, %c0_4], %2 {strides = array<i32>} : memref<8x128xf32, #tpu.memory_space<vmem>>, vector<5x5xf32>,
    %c0_5 = arith.constant 0 : index
    %c0_6 = arith.constant 0 : index
    %4 = vector.load %arg2[%c0_5, %c0_6] : memref<8x128xf32, #tpu.memory_space<vmem>>, vector<8x128xf32>
    %cst_7 = arith.constant 0.000000e+00 : f32
    %5 = vector.broadcast %cst_7 : f32 to vector<120x128xf32>
    %6 = tpu.concatenate %4, %5 in 0 : vector<8x128xf32>, vector<120x128xf32> -> vector<128x128xf32>
    %cst_8 = arith.constant dense<0.000000e+00> : vector<8x128xf32>
    %7 = tpu.matmul %4, %6, %cst_8 {dimension_numbers = #tpu.dot_dimension_numbers<[1], [0], [0], [1], [0, 0, 1, 1], [], []>, precision = #tpu.contract_precision<fp32>} : vector<8x128xf32>, vector<128x128xf32>, vector<8x128xf32> -> vector<8x128xf32>
    %8 = tpu.concatenate %7, %5 in 0 : vector<8x128xf32>, vector<120x128xf32> -> vector<128x128xf32>
    %cst_9 = arith.constant dense<0.000000e+00> : vector<8x128xf32>
    %9 = tpu.matmul %7, %8, %cst_9 {dimension_numbers = #tpu.dot_dimension_numbers<[1], [0], [0], [1], [0, 0, 1, 1], [], []>, precision = #tpu.contract_precision<fp32>} : vector<8x128xf32>, vector<128x128xf32>, vector<8x128xf32> -> vector<8x128xf32>
    %10 = tpu.concatenate %9, %5 in 0 : vector<8x128xf32>, vector<120x128xf32> -> vector<128x128xf32>
    %cst_10 = arith.constant dense<0.000000e+00> : vector<8x128xf32>
    %11 = tpu.matmul %9, %10, %cst_10 {dimension_numbers = #tpu.dot_dimension_numbers<[1], [0], [0], [1], [0, 0, 1, 1], [], []>, precision = #tpu.contract_precision<fp32>} : vector<8x128xf32>, vector<128x128xf32>, vector<8x128xf32> -> vector<8x128xf32>
    %12 = tpu.concatenate %11, %5 in 0 : vector<8x128xf32>, vector<120x128xf32> -> vector<128x128xf32>
    %cst_11 = arith.constant dense<0.000000e+00> : vector<8x128xf32>
    %13 = tpu.matmul %11, %12, %cst_11 {dimension_numbers = #tpu.dot_dimension_numbers<[1], [0], [0], [1], [0, 0, 1, 1], [], []>, precision = #tpu.contract_precision<fp32>} : vector<8x128xf32>, vector<128x128xf32>, vector<8x128xf32> -> vector<8x128xf32>
    %14 = tpu.concatenate %13, %5 in 0 : vector<8x128xf32>, vector<120x128xf32> -> vector<128x128xf32>
    %cst_12 = arith.constant dense<0.000000e+00> : vector<8x128xf32>
    %15 = tpu.matmul %13, %14, %cst_12 {dimension_numbers = #tpu.dot_dimension_numbers<[1], [0], [0], [1], [0, 0, 1, 1], [], []>, precision = #tpu.contract_precision<fp32>} : vector<8x128xf32>, vector<128x128xf32>, vector<8x128xf32> -> vector<8x128xf32>
    %16 = tpu.concatenate %15, %5 in 0 : vector<8x128xf32>, vector<120x128xf32> -> vector<128x128xf32>
    %cst_13 = arith.constant dense<0.000000e+00> : vector<8x128xf32>
    %17 = tpu.matmul %15, %16, %cst_13 {dimension_numbers = #tpu.dot_dimension_numbers<[1], [0], [0], [1], [0, 0, 1, 1], [], []>, precision = #tpu.contract_precision<fp32>} : vector<8x128xf32>, vector<128x128xf32>, vector<8x128xf32> -> vector<8x128xf32>
    %18 = tpu.concatenate %17, %5 in 0 : vector<8x128xf32>, vector<120x128xf32> -> vector<128x128xf32>
    %cst_14 = arith.constant dense<0.000000e+00> : vector<8x128xf32>
    %19 = tpu.matmul %17, %18, %cst_14 {dimension_numbers = #tpu.dot_dimension_numbers<[1], [0], [0], [1], [0, 0, 1, 1], [], []>, precision = #tpu.contract_precision<fp32>} : vector<8x128xf32>, vector<128x128xf32>, vector<8x128xf32> -> vector<8x128xf32>
    %20 = tpu.concatenate %19, %5 in 0 : vector<8x128xf32>, vector<120x128xf32> -> vector<128x128xf32>
    %cst_15 = arith.constant dense<0.000000e+00> : vector<8x128xf32>
    %21 = tpu.matmul %19, %20, %cst_15 {dimension_numbers = #tpu.dot_dimension_numbers<[1], [0], [0], [1], [0, 0, 1, 1], [], []>, precision = #tpu.contract_precision<fp32>} : vector<8x128xf32>, vector<128x128xf32>, vector<8x128xf32> -> vector<8x128xf32>
    %22 = tpu.concatenate %21, %5 in 0 : vector<8x128xf32>, vector<120x128xf32> -> vector<128x128xf32>
    %cst_16 = arith.constant dense<0.000000e+00> : vector<8x128xf32>
    %23 = tpu.matmul %21, %22, %cst_16 {dimension_numbers = #tpu.dot_dimension_numbers<[1], [0], [0], [1], [0, 0, 1, 1], [], []>, precision = #tpu.contract_precision<fp32>} : vector<8x128xf32>, vector<128x128xf32>, vector<8x128xf32> -> vector<8x128xf32>
    %24 = tpu.concatenate %23, %5 in 0 : vector<8x128xf32>, vector<120x128xf32> -> vector<128x128xf32>
    %cst_17 = arith.constant dense<0.000000e+00> : vector<8x128xf32>
    %25 = tpu.matmul %23, %24, %cst_17 {dimension_numbers = #tpu.dot_dimension_numbers<[1], [0], [0], [1], [0, 0, 1, 1], [], []>, precision = #tpu.contract_precision<fp32>} : vector<8x128xf32>, vector<128x128xf32>, vector<8x128xf32> -> vector<8x128xf32>
    %26 = tpu.concatenate %25, %5 in 0 : vector<8x128xf32>, vector<120x128xf32> -> vector<128x128xf32>
    %cst_18 = arith.constant dense<0.000000e+00> : vector<8x128xf32>
    %27 = tpu.matmul %25, %26, %cst_18 {dimension_numbers = #tpu.dot_dimension_numbers<[1], [0], [0], [1], [0, 0, 1, 1], [], []>, precision = #tpu.contract_precision<fp32>} : vector<8x128xf32>, vector<128x128xf32>, vector<8x128xf32> -> vector<8x128xf32>
    %28 = vector.extract_strided_slice %27 {offsets = [0, 0], sizes = [5, 5], strides = [1, 1]} : vector<8x128xf32> to vector<5x5xf32>
    %c0_19 = arith.constant 0 : index
    %c0_20 = arith.constant 0 : index
    %29 = vector.load %arg1[%c0_19, %c0_20] : memref<5x5xf32, #tpu.memory_space<vmem>>, vector<5x5xf32>
    tpu.vector_store %arg1[%c0_19, %c0_20], %28 {strides = array<i32>} : memref<5x5xf32, #tpu.memory_space<vmem>>, vector<5x5xf32>,
    return
  }
}

</mosaic_0001>

<bundles_post_ra>
// kernel: tpu_custom_call.1
= control target key start
LH: loop header
LB: loop body
LE: loop exit
PB: predicated region body
PF: predicated region fallthrough
CT: control target
= control target key end

     0   :  { %6 = vsyncpa [#allocation4], 0  ;;  %s5679_s0 = inlined_call_operand.hbm [shape: f32[5,5], index: 0, kind: input, shape index: {}]   ;;  %s5680_s1 = inlined_call_operand.hbm [shape: f32[5,5], index: 1, kind: output, shape index: {}]  }
   0x1   :  { %7 = vsyncpa [#allocation5], 0  ;;  %s5458_s6 = smov [#allocation3]  }
   0x2   :  { %s14_s7 = sshll.u32 %s5458_s6, 4  ;;  %s15_s7 = int_to_ptr.vmem [resolvable:$true] %s14_s7 }
   0x3   :  { %s5422_s8 = scalar_lea.vmem %s15_s7, 128  ;;  %p5427_p1 = scmp.lt.s32.totalorder %s15_s7, %s15_s7 }
   0x4   :  { %p5423_p0 = scmp.ne.s32.totalorder %s15_s7, %s5422_s8  ;;  %p5428_p2 = scmp.lt.s32.totalorder %s5422_s8, %s5422_s8 }
   0x6   :  { %p5429_p3 = por %p5428_p2, %p5427_p1 }
   0x8   :  { %p5430_p4 = pnand %p5429_p3, %p5423_p0 }
   0xa   :  { %5433 = shalt.err (!%p5430_p4)
}
   0xb   :  { %17 = dma.hbm_to_vmem [thread:$0]  %s5679_s0, 128, %s15_s7, [#allocation4]  }
   0xc   :  { %5454 = dma.done.wait [#allocation4], 128  }
   0xd   :  { %5455 = vsyncadd [#allocation4], 4294967168  ;;  %v5459_v0 = vmov 0.0   ;;  %vm5460_vm0 = vmmov 0   ;;  %vm23_vm1 = vcmask 36864   ;;  %s5461_s0 = smov [#allocation6]  }
   0xe   :  { %21 = vst [vmem:[#allocation2] sm:$0xff] %v5459_v0  ;;  %5080 = vmatprep.subr.mxu0 %v5459_v0  ;;  %5082 = vmatprep.mubr.msk.f32.mxu0 %vm5460_vm0, %v5459_v0  ;;  %v22_v1 = vld [vmem:[#allocation3] sm:$0x1f]  ;;  %s4939_s11 = sshll.u32 %s5461_s0, 4  ;;  %s4940_s11 = int_to_ptr.vmem [resolvable:$true] %s4939_s11 }
   0xf   :  { %5085 = vmatprep.subr.mxu1 %v5459_v0  ;;  %5087 = vmatprep.mubr.msk.f32.mxu1 %vm5460_vm0, %v5459_v0  ;;  %24 = vst.msk [vmem:[#allocation2] sm:$0x1f] %vm23_vm1, %v22_v1  ;;  %s5434_s12 = scalar_lea.vmem %s4940_s11, 128  ;;  %p5439_p6 = scmp.lt.s32.totalorder %s4940_s11, %s4940_s11 }
  0x10   :  { %p5435_p5 = scmp.ne.s32.totalorder %s4940_s11, %s5434_s12  ;;  %p5440_p7 = scmp.lt.s32.totalorder %s5434_s12, %s5434_s12 }
  0x12   :  { %p5441_p8 = por %p5440_p7, %p5439_p6 }
  0x14   :  { %p5442_p9 = pnand %p5441_p8, %p5435_p5 }
  0x16   :  { %v25_v2 = vld [vmem:[#allocation2] sm:$0xff] }
  0x17   :  { %v57_v3 = vand.u32 4294901760, %v25_v2 }
  0x19   :  { %5081 = vmatpush3.msra.mxu0 %v57_v3  ;;  %v93_v4 = vsub.f32 %v25_v2, %v57_v3 }
  0x1a   :  { %5090 = vmatprep.subr.mxu0 %v5459_v0 }
  0x1b   :  { %v94_v5 = vand.u32 4294901760, %v93_v4 }
  0x1d   :  { %v95_v6 = vsub.f32 %v93_v4, %v94_v5 }
  0x1f   :  { %v96_v7 = vand.u32 4294901760, %v95_v6 }
  0x21   :  { %5083 = vmatmul.mubr.f32.vlgmr.msra.gmra.mxu0 %v96_v7  ;;  %5086 = vmatpush3.msra.mxu1 %v96_v7 }
  0x22   :  { %5088 = vmatmul.mubr.f32.vlgmr.msra.gmra.mxu1 %v57_v3  ;;  %5091 = vmatpush3.msra.mxu0 %v93_v4 }
  0x23   :  { %5092 = vmatprep.mubr.msk.f32.mxu0 %vm5460_vm0, %v5459_v0  ;;  %5095 = vmatprep.subr.mxu1 %v5459_v0 }
  0x24   :  { %5096 = vmatpush3.msra.mxu1 %v57_v3  ;;  %5097 = vmatprep.mubr.msk.f32.mxu1 %vm5460_vm0, %v5459_v0 }
  0x25   :  { %5093 = vmatmul.mubr.f32.vlgmr.msra.gmra.mxu0 %v93_v4  ;;  %5100 = vmatprep.subr.mxu0 %v5459_v0 }
  0x26   :  { %5098 = vmatmul.mubr.f32.vlgmr.msra.gmra.mxu1 %v94_v5  ;;  %5101 = vmatpush3.msra.mxu0 %v94_v5 }
  0x27   :  { %5102 = vmatprep.mubr.msk.f32.mxu0 %vm5460_vm0, %v5459_v0  ;;  %5105 = vmatprep.subr.mxu1 %v5459_v0 }
  0x28   :  { %5106 = vmatpush3.msra.mxu1 %v57_v3  ;;  %5107 = vmatprep.mubr.msk.f32.mxu1 %vm5460_vm0, %v5459_v0 }
  0x29   :  { %5103 = vmatmul.mubr.f32.vlgmr.msra.gmra.mxu0 %v57_v3  ;;  %5110 = vmatprep.subr.mxu0 %v5459_v0 }
  0x2a   :  { %5108 = vmatmul.mubr.f32.vlgmr.msra.gmra.mxu1 %v57_v3  ;;  %5112 = vmatprep.mubr.msk.f32.mxu0 %vm5460_vm0, %v5459_v0 }
  0x2b   :  { %5115 = vmatprep.subr.mxu1 %v5459_v0  ;;  %5117 = vmatprep.mubr.msk.f32.mxu1 %vm5460_vm0, %v5459_v0 }
  0xe1   :  { %v98_v8 = vpop.f32.mrf.mxu0 }
  0xe2   :  { %v174_v9 = vpop.f32.mrf.mxu1 }
  0xe3   :  { %v175_v10 = vadd.f32 %v174_v9, %v98_v8  ;;  %v5084_v11 = vpop.f32.mrf.mxu0 }
  0xe4   :  { %v5089_v12 = vpop.f32.mrf.mxu1 }
  0xe5   :  { %v248_v13 = vpop.f32.mrf.mxu0 }
  0xe6   :  { %v249_v14 = vadd.f32 %v248_v13, %v175_v10  ;;  %v322_v15 = vpop.f32.mrf.mxu1 }
  0xe7   :  { %v5094_v16 = vpop.f32.mrf.mxu0 }
  0xe8   :  { %v323_v17 = vadd.f32 %v322_v15, %v249_v14  ;;  %v5099_v18 = vpop.f32.mrf.mxu1 }
  0xe9   :  { %v396_v19 = vpop.f32.mrf.mxu0 }
  0xea   :  { %v397_v20 = vadd.f32 %v396_v19, %v323_v17  ;;  %v468_v21 = vpop.f32.mrf.mxu1 }
  0xeb   :  { %v5104_v22 = vpop.f32.mrf.mxu0 }
  0xec   :  { %v469_v23 = vadd.f32 %v468_v21, %v397_v20  ;;  %v5109_v24 = vpop.f32.mrf.mxu1 }
  0xee   :  { %v503_v25 = vand.u32 4294901760, %v469_v23 }
  0xf0   :  { %v539_v26 = vsub.f32 %v469_v23, %v503_v25  ;;  %5111 = vmatpush3.msra.mxu0 %v503_v25 }
  0xf1   :  { %5120 = vmatprep.subr.mxu0 %v5459_v0 }
  0xf2   :  { %v540_v27 = vand.u32 4294901760, %v539_v26 }
  0xf4   :  { %v541_v28 = vsub.f32 %v539_v26, %v540_v27 }
  0xf6   :  { %v542_v29 = vand.u32 4294901760, %v541_v28 }
  0xf8   :  { %5113 = vmatmul.mubr.f32.vlgmr.msra.gmra.mxu0 %v542_v29  ;;  %5116 = vmatpush3.msra.mxu1 %v542_v29 }
  0xf9   :  { %5121 = vmatpush3.msra.mxu0 %v539_v26  ;;  %5118 = vmatmul.mubr.f32.vlgmr.msra.gmra.mxu1 %v503_v25 }
  0xfa   :  { %5125 = vmatprep.subr.mxu1 %v5459_v0  ;;  %5122 = vmatprep.mubr.msk.f32.mxu0 %vm5460_vm0, %v5459_v0 }
  0xfb   :  { %5126 = vmatpush3.msra.mxu1 %v503_v25  ;;  %5130 = vmatprep.subr.mxu0 %v5459_v0 }
  0xfc   :  { %5123 = vmatmul.mubr.f32.vlgmr.msra.gmra.mxu0 %v539_v26  ;;  %5127 = vmatprep.mubr.msk.f32.mxu1 %vm5460_vm0, %v5459_v0 }
  0xfd   :  { %5131 = vmatpush3.msra.mxu0 %v540_v27  ;;  %5135 = vmatprep.subr.mxu1 %v5459_v0 }
  0xfe   :  { %5128 = vmatmul.mubr.f32.vlgmr.msra.gmra.mxu1 %v540_v27  ;;  %5132 = vmatprep.mubr.msk.f32.mxu0 %vm5460_vm0, %v5459_v0 }
  0xff   :  { %5136 = vmatpush3.msra.mxu1 %v503_v25  ;;  %5137 = vmatprep.mubr.msk.f32.mxu1 %vm5460_vm0, %v5459_v0 }
 0x100   :  { %5133 = vmatmul.mubr.f32.vlgmr.msra.gmra.mxu0 %v503_v25  ;;  %5140 = vmatprep.subr.mxu0 %v5459_v0 }
 0x101   :  { %5142 = vmatprep.mubr.msk.f32.mxu0 %vm5460_vm0, %v5459_v0  ;;  %5145 = vmatprep.subr.mxu1 %v5459_v0 }
 0x102   :  { %5138 = vmatmul.mubr.f32.vlgmr.msra.gmra.mxu1 %v503_v25 }
 0x103   :  { %5147 = vmatprep.mubr.msk.f32.mxu1 %vm5460_vm0, %v5459_v0 }
 0x1b8   :  { %v544_v30 = vpop.f32.mrf.mxu0 }
 0x1b9   :  { %v620_v31 = vpop.f32.mrf.mxu1 }
 0x1ba   :  { %v621_v32 = vadd.f32 %v620_v31, %v544_v30  ;;  %v5114_v33 = vpop.f32.mrf.mxu0 }
 0x1bb   :  { %v5119_v34 = vpop.f32.mrf.mxu1 }
 0x1bc   :  { %v694_v35 = vpop.f32.mrf.mxu0 }
 0x1bd   :  { %v695_v36 = vadd.f32 %v694_v35, %v621_v32 }
 0x1be   :  { %v768_v37 = vpop.f32.mrf.mxu1  ;;  %v5124_v38 = vpop.f32.mrf.mxu0 }
 0x1bf   :  { %v769_v39 = vadd.f32 %v768_v37, %v695_v36 }
 0x1c0   :  { %v5129_v40 = vpop.f32.mrf.mxu1  ;;  %v842_v41 = vpop.f32.mrf.mxu0 }
 0x1c1   :  { %v843_v42 = vadd.f32 %v842_v41, %v769_v39 }
 0x1c2   :  { %v914_v43 = vpop.f32.mrf.mxu1  ;;  %v5134_v44 = vpop.f32.mrf.mxu0 }
 0x1c3   :  { %v915_v45 = vadd.f32 %v914_v43, %v843_v42 }
 0x1c4   :  { %v5139_v46 = vpop.f32.mrf.mxu1 }
 0x1c5   :  { %v949_v47 = vand.u32 4294901760, %v915_v45 }
 0x1c7   :  { %v985_v48 = vsub.f32 %v915_v45, %v949_v47  ;;  %5141 = vmatpush3.msra.mxu0 %v949_v47 }
 0x1c8   :  { %5150 = vmatprep.subr.mxu0 %v5459_v0 }
 0x1c9   :  { %v986_v49 = vand.u32 4294901760, %v985_v48 }
 0x1cb   :  { %v987_v50 = vsub.f32 %v985_v48, %v986_v49 }
 0x1cd   :  { %v988_v51 = vand.u32 4294901760, %v987_v50 }
 0x1cf   :  { %5143 = vmatmul.mubr.f32.vlgmr.msra.gmra.mxu0 %v988_v51  ;;  %5146 = vmatpush3.msra.mxu1 %v988_v51 }
 0x1d0   :  { %5151 = vmatpush3.msra.mxu0 %v985_v48  ;;  %5148 = vmatmul.mubr.f32.vlgmr.msra.gmra.mxu1 %v949_v47 }
 0x1d1   :  { %5155 = vmatprep.subr.mxu1 %v5459_v0  ;;  %5152 = vmatprep.mubr.msk.f32.mxu0 %vm5460_vm0, %v5459_v0 }
 0x1d2   :  { %5156 = vmatpush3.msra.mxu1 %v949_v47  ;;  %5160 = vmatprep.subr.mxu0 %v5459_v0 }
 0x1d3   :  { %5153 = vmatmul.mubr.f32.vlgmr.msra.gmra.mxu0 %v985_v48  ;;  %5157 = vmatprep.mubr.msk.f32.mxu1 %vm5460_vm0, %v5459_v0 }
 0x1d4   :  { %5161 = vmatpush3.msra.mxu0 %v986_v49  ;;  %5165 = vmatprep.subr.mxu1 %v5459_v0 }
 0x1d5   :  { %5158 = vmatmul.mubr.f32.vlgmr.msra.gmra.mxu1 %v986_v49  ;;  %5162 = vmatprep.mubr.msk.f32.mxu0 %vm5460_vm0, %v5459_v0 }
 0x1d6   :  { %5166 = vmatpush3.msra.mxu1 %v949_v47  ;;  %5167 = vmatprep.mubr.msk.f32.mxu1 %vm5460_vm0, %v5459_v0 }
 0x1d7   :  { %5163 = vmatmul.mubr.f32.vlgmr.msra.gmra.mxu0 %v949_v47  ;;  %5170 = vmatprep.subr.mxu0 %v5459_v0 }
 0x1d8   :  { %5172 = vmatprep.mubr.msk.f32.mxu0 %vm5460_vm0, %v5459_v0  ;;  %5175 = vmatprep.subr.mxu1 %v5459_v0 }
 0x1d9   :  { %5168 = vmatmul.mubr.f32.vlgmr.msra.gmra.mxu1 %v949_v47 }
 0x1da   :  { %5177 = vmatprep.mubr.msk.f32.mxu1 %vm5460_vm0, %v5459_v0 }
 0x28f   :  { %v990_v52 = vpop.f32.mrf.mxu0 }
 0x290   :  { %v1066_v53 = vpop.f32.mrf.mxu1 }
 0x291   :  { %v1067_v54 = vadd.f32 %v1066_v53, %v990_v52  ;;  %v5144_v55 = vpop.f32.mrf.mxu0 }
 0x292   :  { %v5149_v56 = vpop.f32.mrf.mxu1 }
 0x293   :  { %v1140_v57 = vpop.f32.mrf.mxu0 }
 0x294   :  { %v1141_v58 = vadd.f32 %v1140_v57, %v1067_v54 }
 0x295   :  { %v1214_v59 = vpop.f32.mrf.mxu1  ;;  %v5154_v60 = vpop.f32.mrf.mxu0 }
 0x296   :  { %v1215_v61 = vadd.f32 %v1214_v59, %v1141_v58 }
 0x297   :  { %v5159_v62 = vpop.f32.mrf.mxu1  ;;  %v1288_v63 = vpop.f32.mrf.mxu0 }
 0x298   :  { %v1289_v1 = vadd.f32 %v1288_v63, %v1215_v61 }
 0x299   :  { %v1360_v2 = vpop.f32.mrf.mxu1  ;;  %v5164_v3 = vpop.f32.mrf.mxu0 }
 0x29a   :  { %v1361_v4 = vadd.f32 %v1360_v2, %v1289_v1 }
 0x29b   :  { %v5169_v5 = vpop.f32.mrf.mxu1 }
 0x29c   :  { %v1395_v6 = vand.u32 4294901760, %v1361_v4 }
 0x29e   :  { %v1431_v7 = vsub.f32 %v1361_v4, %v1395_v6  ;;  %5171 = vmatpush3.msra.mxu0 %v1395_v6 }
 0x29f   :  { %5180 = vmatprep.subr.mxu0 %v5459_v0 }
 0x2a0   :  { %v1432_v8 = vand.u32 4294901760, %v1431_v7 }
 0x2a2   :  { %v1433_v9 = vsub.f32 %v1431_v7, %v1432_v8 }
 0x2a4   :  { %v1434_v10 = vand.u32 4294901760, %v1433_v9 }
 0x2a6   :  { %5173 = vmatmul.mubr.f32.vlgmr.msra.gmra.mxu0 %v1434_v10  ;;  %5176 = vmatpush3.msra.mxu1 %v1434_v10 }
 0x2a7   :  { %5181 = vmatpush3.msra.mxu0 %v1431_v7  ;;  %5178 = vmatmul.mubr.f32.vlgmr.msra.gmra.mxu1 %v1395_v6 }
 0x2a8   :  { %5185 = vmatprep.subr.mxu1 %v5459_v0  ;;  %5182 = vmatprep.mubr.msk.f32.mxu0 %vm5460_vm0, %v5459_v0 }
 0x2a9   :  { %5186 = vmatpush3.msra.mxu1 %v1395_v6  ;;  %5190 = vmatprep.subr.mxu0 %v5459_v0 }
 0x2aa   :  { %5183 = vmatmul.mubr.f32.vlgmr.msra.gmra.mxu0 %v1431_v7  ;;  %5187 = vmatprep.mubr.msk.f32.mxu1 %vm5460_vm0, %v5459_v0 }
 0x2ab   :  { %5191 = vmatpush3.msra.mxu0 %v1432_v8  ;;  %5195 = vmatprep.subr.mxu1 %v5459_v0 }
 0x2ac   :  { %5188 = vmatmul.mubr.f32.vlgmr.msra.gmra.mxu1 %v1432_v8  ;;  %5192 = vmatprep.mubr.msk.f32.mxu0 %vm5460_vm0, %v5459_v0 }
 0x2ad   :  { %5196 = vmatpush3.msra.mxu1 %v1395_v6  ;;  %5197 = vmatprep.mubr.msk.f32.mxu1 %vm5460_vm0, %v5459_v0 }
 0x2ae   :  { %5193 = vmatmul.mubr.f32.vlgmr.msra.gmra.mxu0 %v1395_v6  ;;  %5200 = vmatprep.subr.mxu0 %v5459_v0 }
 0x2af   :  { %5202 = vmatprep.mubr.msk.f32.mxu0 %vm5460_vm0, %v5459_v0  ;;  %5205 = vmatprep.subr.mxu1 %v5459_v0 }
 0x2b0   :  { %5198 = vmatmul.mubr.f32.vlgmr.msra.gmra.mxu1 %v1395_v6 }
 0x2b1   :  { %5207 = vmatprep.mubr.msk.f32.mxu1 %vm5460_vm0, %v5459_v0 }
 0x366   :  { %v1436_v11 = vpop.f32.mrf.mxu0 }
 0x367   :  { %v1512_v12 = vpop.f32.mrf.mxu1 }
 0x368   :  { %v1513_v13 = vadd.f32 %v1512_v12, %v1436_v11  ;;  %v5174_v14 = vpop.f32.mrf.mxu0 }
 0x369   :  { %v5179_v15 = vpop.f32.mrf.mxu1 }
 0x36a   :  { %v1586_v16 = vpop.f32.mrf.mxu0 }
 0x36b   :  { %v1587_v17 = vadd.f32 %v1586_v16, %v1513_v13 }
 0x36c   :  { %v1660_v18 = vpop.f32.mrf.mxu1  ;;  %v5184_v19 = vpop.f32.mrf.mxu0 }
 0x36d   :  { %v1661_v20 = vadd.f32 %v1660_v18, %v1587_v17 }
 0x36e   :  { %v5189_v21 = vpop.f32.mrf.mxu1  ;;  %v1734_v22 = vpop.f32.mrf.mxu0 }
 0x36f   :  { %v1735_v23 = vadd.f32 %v1734_v22, %v1661_v20 }
 0x370   :  { %v1806_v24 = vpop.f32.mrf.mxu1  ;;  %v5194_v25 = vpop.f32.mrf.mxu0 }
 0x371   :  { %v1807_v26 = vadd.f32 %v1806_v24, %v1735_v23 }
 0x372   :  { %v5199_v27 = vpop.f32.mrf.mxu1 }
 0x373   :  { %v1841_v28 = vand.u32 4294901760, %v1807_v26 }
 0x375   :  { %v1877_v29 = vsub.f32 %v1807_v26, %v1841_v28  ;;  %5201 = vmatpush3.msra.mxu0 %v1841_v28 }
 0x376   :  { %5210 = vmatprep.subr.mxu0 %v5459_v0 }
 0x377   :  { %v1878_v30 = vand.u32 4294901760, %v1877_v29 }
 0x379   :  { %v1879_v31 = vsub.f32 %v1877_v29, %v1878_v30 }
 0x37b   :  { %v1880_v32 = vand.u32 4294901760, %v1879_v31 }
 0x37d   :  { %5203 = vmatmul.mubr.f32.vlgmr.msra.gmra.mxu0 %v1880_v32  ;;  %5206 = vmatpush3.msra.mxu1 %v1880_v32 }
 0x37e   :  { %5211 = vmatpush3.msra.mxu0 %v1877_v29  ;;  %5208 = vmatmul.mubr.f32.vlgmr.msra.gmra.mxu1 %v1841_v28 }
 0x37f   :  { %5215 = vmatprep.subr.mxu1 %v5459_v0  ;;  %5212 = vmatprep.mubr.msk.f32.mxu0 %vm5460_vm0, %v5459_v0 }
 0x380   :  { %5216 = vmatpush3.msra.mxu1 %v1841_v28  ;;  %5220 = vmatprep.subr.mxu0 %v5459_v0 }
 0x381   :  { %5213 = vmatmul.mubr.f32.vlgmr.msra.gmra.mxu0 %v1877_v29  ;;  %5217 = vmatprep.mubr.msk.f32.mxu1 %vm5460_vm0, %v5459_v0 }
 0x382   :  { %5221 = vmatpush3.msra.mxu0 %v1878_v30  ;;  %5225 = vmatprep.subr.mxu1 %v5459_v0 }
 0x383   :  { %5218 = vmatmul.mubr.f32.vlgmr.msra.gmra.mxu1 %v1878_v30  ;;  %5222 = vmatprep.mubr.msk.f32.mxu0 %vm5460_vm0, %v5459_v0 }
 0x384   :  { %5226 = vmatpush3.msra.mxu1 %v1841_v28  ;;  %5227 = vmatprep.mubr.msk.f32.mxu1 %vm5460_vm0, %v5459_v0 }
 0x385   :  { %5223 = vmatmul.mubr.f32.vlgmr.msra.gmra.mxu0 %v1841_v28  ;;  %5230 = vmatprep.subr.mxu0 %v5459_v0 }
 0x386   :  { %5232 = vmatprep.mubr.msk.f32.mxu0 %vm5460_vm0, %v5459_v0  ;;  %5235 = vmatprep.subr.mxu1 %v5459_v0 }
 0x387   :  { %5228 = vmatmul.mubr.f32.vlgmr.msra.gmra.mxu1 %v1841_v28 }
 0x388   :  { %5237 = vmatprep.mubr.msk.f32.mxu1 %vm5460_vm0, %v5459_v0 }
 0x43d   :  { %v1882_v33 = vpop.f32.mrf.mxu0 }
 0x43e   :  { %v1958_v34 = vpop.f32.mrf.mxu1 }
 0x43f   :  { %v1959_v35 = vadd.f32 %v1958_v34, %v1882_v33  ;;  %v5204_v36 = vpop.f32.mrf.mxu0 }
 0x440   :  { %v5209_v37 = vpop.f32.mrf.mxu1 }
 0x441   :  { %v2032_v38 = vpop.f32.mrf.mxu0 }
 0x442   :  { %v2033_v39 = vadd.f32 %v2032_v38, %v1959_v35 }
 0x443   :  { %v2106_v40 = vpop.f32.mrf.mxu1  ;;  %v5214_v41 = vpop.f32.mrf.mxu0 }
 0x444   :  { %v2107_v42 = vadd.f32 %v2106_v40, %v2033_v39 }
 0x445   :  { %v5219_v43 = vpop.f32.mrf.mxu1  ;;  %v2180_v44 = vpop.f32.mrf.mxu0 }
 0x446   :  { %v2181_v45 = vadd.f32 %v2180_v44, %v2107_v42 }
 0x447   :  { %v2252_v46 = vpop.f32.mrf.mxu1  ;;  %v5224_v47 = vpop.f32.mrf.mxu0 }
 0x448   :  { %v2253_v48 = vadd.f32 %v2252_v46, %v2181_v45 }
 0x449   :  { %v5229_v49 = vpop.f32.mrf.mxu1 }
 0x44a   :  { %v2287_v50 = vand.u32 4294901760, %v2253_v48 }
 0x44c   :  { %v2323_v51 = vsub.f32 %v2253_v48, %v2287_v50  ;;  %5231 = vmatpush3.msra.mxu0 %v2287_v50 }
 0x44d   :  { %5240 = vmatprep.subr.mxu0 %v5459_v0 }
 0x44e   :  { %v2324_v52 = vand.u32 4294901760, %v2323_v51 }
 0x450   :  { %v2325_v53 = vsub.f32 %v2323_v51, %v2324_v52 }
 0x452   :  { %v2326_v54 = vand.u32 4294901760, %v2325_v53 }
 0x454   :  { %5233 = vmatmul.mubr.f32.vlgmr.msra.gmra.mxu0 %v2326_v54  ;;  %5236 = vmatpush3.msra.mxu1 %v2326_v54 }
 0x455   :  { %5241 = vmatpush3.msra.mxu0 %v2323_v51  ;;  %5238 = vmatmul.mubr.f32.vlgmr.msra.gmra.mxu1 %v2287_v50 }
 0x456   :  { %5245 = vmatprep.subr.mxu1 %v5459_v0  ;;  %5242 = vmatprep.mubr.msk.f32.mxu0 %vm5460_vm0, %v5459_v0 }
 0x457   :  { %5246 = vmatpush3.msra.mxu1 %v2287_v50  ;;  %5250 = vmatprep.subr.mxu0 %v5459_v0 }
 0x458   :  { %5243 = vmatmul.mubr.f32.vlgmr.msra.gmra.mxu0 %v2323_v51  ;;  %5247 = vmatprep.mubr.msk.f32.mxu1 %vm5460_vm0, %v5459_v0 }
 0x459   :  { %5251 = vmatpush3.msra.mxu0 %v2324_v52  ;;  %5255 = vmatprep.subr.mxu1 %v5459_v0 }
 0x45a   :  { %5248 = vmatmul.mubr.f32.vlgmr.msra.gmra.mxu1 %v2324_v52  ;;  %5252 = vmatprep.mubr.msk.f32.mxu0 %vm5460_vm0, %v5459_v0 }
 0x45b   :  { %5256 = vmatpush3.msra.mxu1 %v2287_v50  ;;  %5257 = vmatprep.mubr.msk.f32.mxu1 %vm5460_vm0, %v5459_v0 }
 0x45c   :  { %5253 = vmatmul.mubr.f32.vlgmr.msra.gmra.mxu0 %v2287_v50  ;;  %5260 = vmatprep.subr.mxu0 %v5459_v0 }
 0x45d   :  { %5262 = vmatprep.mubr.msk.f32.mxu0 %vm5460_vm0, %v5459_v0  ;;  %5265 = vmatprep.subr.mxu1 %v5459_v0 }
 0x45e   :  { %5258 = vmatmul.mubr.f32.vlgmr.msra.gmra.mxu1 %v2287_v50 }
 0x45f   :  { %5267 = vmatprep.mubr.msk.f32.mxu1 %vm5460_vm0, %v5459_v0 }
 0x514   :  { %v2328_v55 = vpop.f32.mrf.mxu0 }
 0x515   :  { %v2404_v56 = vpop.f32.mrf.mxu1 }
 0x516   :  { %v2405_v57 = vadd.f32 %v2404_v56, %v2328_v55  ;;  %v5234_v58 = vpop.f32.mrf.mxu0 }
 0x517   :  { %v5239_v59 = vpop.f32.mrf.mxu1 }
 0x518   :  { %v2478_v60 = vpop.f32.mrf.mxu0 }
 0x519   :  { %v2479_v61 = vadd.f32 %v2478_v60, %v2405_v57 }
 0x51a   :  { %v2552_v62 = vpop.f32.mrf.mxu1  ;;  %v5244_v63 = vpop.f32.mrf.mxu0 }
 0x51b   :  { %v2553_v1 = vadd.f32 %v2552_v62, %v2479_v61 }
 0x51c   :  { %v5249_v2 = vpop.f32.mrf.mxu1  ;;  %v2626_v3 = vpop.f32.mrf.mxu0 }
 0x51d   :  { %v2627_v4 = vadd.f32 %v2626_v3, %v2553_v1 }
 0x51e   :  { %v2698_v5 = vpop.f32.mrf.mxu1  ;;  %v5254_v6 = vpop.f32.mrf.mxu0 }
 0x51f   :  { %v2699_v7 = vadd.f32 %v2698_v5, %v2627_v4 }
 0x520   :  { %v5259_v8 = vpop.f32.mrf.mxu1 }
 0x521   :  { %v2733_v9 = vand.u32 4294901760, %v2699_v7 }
 0x523   :  { %v2769_v10 = vsub.f32 %v2699_v7, %v2733_v9  ;;  %5261 = vmatpush3.msra.mxu0 %v2733_v9 }
 0x524   :  { %5270 = vmatprep.subr.mxu0 %v5459_v0 }
 0x525   :  { %v2770_v11 = vand.u32 4294901760, %v2769_v10 }
 0x527   :  { %v2771_v12 = vsub.f32 %v2769_v10, %v2770_v11 }
 0x529   :  { %v2772_v13 = vand.u32 4294901760, %v2771_v12 }
 0x52b   :  { %5263 = vmatmul.mubr.f32.vlgmr.msra.gmra.mxu0 %v2772_v13  ;;  %5266 = vmatpush3.msra.mxu1 %v2772_v13 }
 0x52c   :  { %5271 = vmatpush3.msra.mxu0 %v2769_v10  ;;  %5268 = vmatmul.mubr.f32.vlgmr.msra.gmra.mxu1 %v2733_v9 }
 0x52d   :  { %5275 = vmatprep.subr.mxu1 %v5459_v0  ;;  %5272 = vmatprep.mubr.msk.f32.mxu0 %vm5460_vm0, %v5459_v0 }
 0x52e   :  { %5276 = vmatpush3.msra.mxu1 %v2733_v9  ;;  %5280 = vmatprep.subr.mxu0 %v5459_v0 }
 0x52f   :  { %5273 = vmatmul.mubr.f32.vlgmr.msra.gmra.mxu0 %v2769_v10  ;;  %5277 = vmatprep.mubr.msk.f32.mxu1 %vm5460_vm0, %v5459_v0 }
 0x530   :  { %5281 = vmatpush3.msra.mxu0 %v2770_v11  ;;  %5285 = vmatprep.subr.mxu1 %v5459_v0 }
 0x531   :  { %5278 = vmatmul.mubr.f32.vlgmr.msra.gmra.mxu1 %v2770_v11  ;;  %5282 = vmatprep.mubr.msk.f32.mxu0 %vm5460_vm0, %v5459_v0 }
 0x532   :  { %5286 = vmatpush3.msra.mxu1 %v2733_v9  ;;  %5287 = vmatprep.mubr.msk.f32.mxu1 %vm5460_vm0, %v5459_v0 }
 0x533   :  { %5283 = vmatmul.mubr.f32.vlgmr.msra.gmra.mxu0 %v2733_v9  ;;  %5290 = vmatprep.subr.mxu0 %v5459_v0 }
 0x534   :  { %5292 = vmatprep.mubr.msk.f32.mxu0 %vm5460_vm0, %v5459_v0  ;;  %5295 = vmatprep.subr.mxu1 %v5459_v0 }
 0x535   :  { %5288 = vmatmul.mubr.f32.vlgmr.msra.gmra.mxu1 %v2733_v9 }
 0x536   :  { %5297 = vmatprep.mubr.msk.f32.mxu1 %vm5460_vm0, %v5459_v0 }
 0x5eb   :  { %v2774_v14 = vpop.f32.mrf.mxu0 }
 0x5ec   :  { %v2850_v15 = vpop.f32.mrf.mxu1 }
 0x5ed   :  { %v2851_v16 = vadd.f32 %v2850_v15, %v2774_v14  ;;  %v5264_v17 = vpop.f32.mrf.mxu0 }
 0x5ee   :  { %v5269_v18 = vpop.f32.mrf.mxu1 }
 0x5ef   :  { %v2924_v19 = vpop.f32.mrf.mxu0 }
 0x5f0   :  { %v2925_v20 = vadd.f32 %v2924_v19, %v2851_v16 }
 0x5f1   :  { %v2998_v21 = vpop.f32.mrf.mxu1  ;;  %v5274_v22 = vpop.f32.mrf.mxu0 }
 0x5f2   :  { %v2999_v23 = vadd.f32 %v2998_v21, %v2925_v20 }
 0x5f3   :  { %v5279_v24 = vpop.f32.mrf.mxu1  ;;  %v3072_v25 = vpop.f32.mrf.mxu0 }
 0x5f4   :  { %v3073_v26 = vadd.f32 %v3072_v25, %v2999_v23 }
 0x5f5   :  { %v3144_v27 = vpop.f32.mrf.mxu1  ;;  %v5284_v28 = vpop.f32.mrf.mxu0 }
 0x5f6   :  { %v3145_v29 = vadd.f32 %v3144_v27, %v3073_v26 }
 0x5f7   :  { %v5289_v30 = vpop.f32.mrf.mxu1 }
 0x5f8   :  { %v3179_v31 = vand.u32 4294901760, %v3145_v29 }
 0x5fa   :  { %v3215_v32 = vsub.f32 %v3145_v29, %v3179_v31  ;;  %5291 = vmatpush3.msra.mxu0 %v3179_v31 }
 0x5fb   :  { %5300 = vmatprep.subr.mxu0 %v5459_v0 }
 0x5fc   :  { %v3216_v33 = vand.u32 4294901760, %v3215_v32 }
 0x5fe   :  { %v3217_v34 = vsub.f32 %v3215_v32, %v3216_v33 }
 0x600   :  { %v3218_v35 = vand.u32 4294901760, %v3217_v34 }
 0x602   :  { %5293 = vmatmul.mubr.f32.vlgmr.msra.gmra.mxu0 %v3218_v35  ;;  %5296 = vmatpush3.msra.mxu1 %v3218_v35 }
 0x603   :  { %5301 = vmatpush3.msra.mxu0 %v3215_v32  ;;  %5298 = vmatmul.mubr.f32.vlgmr.msra.gmra.mxu1 %v3179_v31 }
 0x604   :  { %5305 = vmatprep.subr.mxu1 %v5459_v0  ;;  %5302 = vmatprep.mubr.msk.f32.mxu0 %vm5460_vm0, %v5459_v0 }
 0x605   :  { %5306 = vmatpush3.msra.mxu1 %v3179_v31  ;;  %5310 = vmatprep.subr.mxu0 %v5459_v0 }
 0x606   :  { %5303 = vmatmul.mubr.f32.vlgmr.msra.gmra.mxu0 %v3215_v32  ;;  %5307 = vmatprep.mubr.msk.f32.mxu1 %vm5460_vm0, %v5459_v0 }
 0x607   :  { %5311 = vmatpush3.msra.mxu0 %v3216_v33  ;;  %5315 = vmatprep.subr.mxu1 %v5459_v0 }
 0x608   :  { %5308 = vmatmul.mubr.f32.vlgmr.msra.gmra.mxu1 %v3216_v33  ;;  %5312 = vmatprep.mubr.msk.f32.mxu0 %vm5460_vm0, %v5459_v0 }
 0x609   :  { %5316 = vmatpush3.msra.mxu1 %v3179_v31  ;;  %5317 = vmatprep.mubr.msk.f32.mxu1 %vm5460_vm0, %v5459_v0 }
 0x60a   :  { %5313 = vmatmul.mubr.f32.vlgmr.msra.gmra.mxu0 %v3179_v31  ;;  %5320 = vmatprep.subr.mxu0 %v5459_v0 }
 0x60b   :  { %5322 = vmatprep.mubr.msk.f32.mxu0 %vm5460_vm0, %v5459_v0  ;;  %5325 = vmatprep.subr.mxu1 %v5459_v0 }
 0x60c   :  { %5318 = vmatmul.mubr.f32.vlgmr.msra.gmra.mxu1 %v3179_v31 }
 0x60d   :  { %5327 = vmatprep.mubr.msk.f32.mxu1 %vm5460_vm0, %v5459_v0 }
 0x6c2   :  { %v3220_v36 = vpop.f32.mrf.mxu0 }
 0x6c3   :  { %v3296_v37 = vpop.f32.mrf.mxu1 }
 0x6c4   :  { %v3297_v38 = vadd.f32 %v3296_v37, %v3220_v36  ;;  %v5294_v39 = vpop.f32.mrf.mxu0 }
 0x6c5   :  { %v5299_v40 = vpop.f32.mrf.mxu1 }
 0x6c6   :  { %v3370_v41 = vpop.f32.mrf.mxu0 }
 0x6c7   :  { %v3371_v42 = vadd.f32 %v3370_v41, %v3297_v38 }
 0x6c8   :  { %v3444_v43 = vpop.f32.mrf.mxu1  ;;  %v5304_v44 = vpop.f32.mrf.mxu0 }
 0x6c9   :  { %v3445_v45 = vadd.f32 %v3444_v43, %v3371_v42 }
 0x6ca   :  { %v5309_v46 = vpop.f32.mrf.mxu1  ;;  %v3518_v47 = vpop.f32.mrf.mxu0 }
 0x6cb   :  { %v3519_v48 = vadd.f32 %v3518_v47, %v3445_v45 }
 0x6cc   :  { %v3590_v49 = vpop.f32.mrf.mxu1  ;;  %v5314_v50 = vpop.f32.mrf.mxu0 }
 0x6cd   :  { %v3591_v51 = vadd.f32 %v3590_v49, %v3519_v48 }
 0x6ce   :  { %v5319_v52 = vpop.f32.mrf.mxu1 }
 0x6cf   :  { %v3625_v53 = vand.u32 4294901760, %v3591_v51 }
 0x6d1   :  { %v3661_v54 = vsub.f32 %v3591_v51, %v3625_v53  ;;  %5321 = vmatpush3.msra.mxu0 %v3625_v53 }
 0x6d2   :  { %5330 = vmatprep.subr.mxu0 %v5459_v0 }
 0x6d3   :  { %v3662_v55 = vand.u32 4294901760, %v3661_v54 }
 0x6d5   :  { %v3663_v56 = vsub.f32 %v3661_v54, %v3662_v55 }
 0x6d7   :  { %v3664_v57 = vand.u32 4294901760, %v3663_v56 }
 0x6d9   :  { %5323 = vmatmul.mubr.f32.vlgmr.msra.gmra.mxu0 %v3664_v57  ;;  %5326 = vmatpush3.msra.mxu1 %v3664_v57 }
 0x6da   :  { %5331 = vmatpush3.msra.mxu0 %v3661_v54  ;;  %5328 = vmatmul.mubr.f32.vlgmr.msra.gmra.mxu1 %v3625_v53 }
 0x6db   :  { %5335 = vmatprep.subr.mxu1 %v5459_v0  ;;  %5332 = vmatprep.mubr.msk.f32.mxu0 %vm5460_vm0, %v5459_v0 }
 0x6dc   :  { %5336 = vmatpush3.msra.mxu1 %v3625_v53  ;;  %5340 = vmatprep.subr.mxu0 %v5459_v0 }
 0x6dd   :  { %5333 = vmatmul.mubr.f32.vlgmr.msra.gmra.mxu0 %v3661_v54  ;;  %5337 = vmatprep.mubr.msk.f32.mxu1 %vm5460_vm0, %v5459_v0 }
 0x6de   :  { %5341 = vmatpush3.msra.mxu0 %v3662_v55  ;;  %5345 = vmatprep.subr.mxu1 %v5459_v0 }
 0x6df   :  { %5338 = vmatmul.mubr.f32.vlgmr.msra.gmra.mxu1 %v3662_v55  ;;  %5342 = vmatprep.mubr.msk.f32.mxu0 %vm5460_vm0, %v5459_v0 }
 0x6e0   :  { %5346 = vmatpush3.msra.mxu1 %v3625_v53  ;;  %5347 = vmatprep.mubr.msk.f32.mxu1 %vm5460_vm0, %v5459_v0 }
 0x6e1   :  { %5343 = vmatmul.mubr.f32.vlgmr.msra.gmra.mxu0 %v3625_v53  ;;  %5350 = vmatprep.subr.mxu0 %v5459_v0 }
 0x6e2   :  { %5352 = vmatprep.mubr.msk.f32.mxu0 %vm5460_vm0, %v5459_v0  ;;  %5355 = vmatprep.subr.mxu1 %v5459_v0 }
 0x6e3   :  { %5348 = vmatmul.mubr.f32.vlgmr.msra.gmra.mxu1 %v3625_v53 }
 0x6e4   :  { %5357 = vmatprep.mubr.msk.f32.mxu1 %vm5460_vm0, %v5459_v0 }
 0x799   :  { %v3666_v58 = vpop.f32.mrf.mxu0 }
 0x79a   :  { %v3742_v59 = vpop.f32.mrf.mxu1 }
 0x79b   :  { %v3743_v60 = vadd.f32 %v3742_v59, %v3666_v58  ;;  %v5324_v61 = vpop.f32.mrf.mxu0 }
 0x79c   :  { %v5329_v62 = vpop.f32.mrf.mxu1 }
 0x79d   :  { %v3816_v63 = vpop.f32.mrf.mxu0 }
 0x79e   :  { %v3817_v1 = vadd.f32 %v3816_v63, %v3743_v60 }
 0x79f   :  { %v3890_v2 = vpop.f32.mrf.mxu1  ;;  %v5334_v3 = vpop.f32.mrf.mxu0 }
 0x7a0   :  { %v3891_v4 = vadd.f32 %v3890_v2, %v3817_v1 }
 0x7a1   :  { %v5339_v5 = vpop.f32.mrf.mxu1  ;;  %v3964_v6 = vpop.f32.mrf.mxu0 }
 0x7a2   :  { %v3965_v7 = vadd.f32 %v3964_v6, %v3891_v4 }
 0x7a3   :  { %v4036_v8 = vpop.f32.mrf.mxu1  ;;  %v5344_v9 = vpop.f32.mrf.mxu0 }
 0x7a4   :  { %v4037_v10 = vadd.f32 %v4036_v8, %v3965_v7 }
 0x7a5   :  { %v5349_v11 = vpop.f32.mrf.mxu1 }
 0x7a6   :  { %v4071_v12 = vand.u32 4294901760, %v4037_v10 }
 0x7a8   :  { %v4107_v13 = vsub.f32 %v4037_v10, %v4071_v12  ;;  %5351 = vmatpush3.msra.mxu0 %v4071_v12 }
 0x7a9   :  { %5360 = vmatprep.subr.mxu0 %v5459_v0 }
 0x7aa   :  { %v4108_v14 = vand.u32 4294901760, %v4107_v13 }
 0x7ac   :  { %v4109_v15 = vsub.f32 %v4107_v13, %v4108_v14 }
 0x7ae   :  { %v4110_v16 = vand.u32 4294901760, %v4109_v15 }
 0x7b0   :  { %5353 = vmatmul.mubr.f32.vlgmr.msra.gmra.mxu0 %v4110_v16  ;;  %5356 = vmatpush3.msra.mxu1 %v4110_v16 }
 0x7b1   :  { %5361 = vmatpush3.msra.mxu0 %v4107_v13  ;;  %5358 = vmatmul.mubr.f32.vlgmr.msra.gmra.mxu1 %v4071_v12 }
 0x7b2   :  { %5365 = vmatprep.subr.mxu1 %v5459_v0  ;;  %5362 = vmatprep.mubr.msk.f32.mxu0 %vm5460_vm0, %v5459_v0 }
 0x7b3   :  { %5366 = vmatpush3.msra.mxu1 %v4071_v12  ;;  %5370 = vmatprep.subr.mxu0 %v5459_v0 }
 0x7b4   :  { %5363 = vmatmul.mubr.f32.vlgmr.msra.gmra.mxu0 %v4107_v13  ;;  %5367 = vmatprep.mubr.msk.f32.mxu1 %vm5460_vm0, %v5459_v0 }
 0x7b5   :  { %5371 = vmatpush3.msra.mxu0 %v4108_v14  ;;  %5375 = vmatprep.subr.mxu1 %v5459_v0 }
 0x7b6   :  { %5368 = vmatmul.mubr.f32.vlgmr.msra.gmra.mxu1 %v4108_v14  ;;  %5372 = vmatprep.mubr.msk.f32.mxu0 %vm5460_vm0, %v5459_v0 }
 0x7b7   :  { %5376 = vmatpush3.msra.mxu1 %v4071_v12  ;;  %5377 = vmatprep.mubr.msk.f32.mxu1 %vm5460_vm0, %v5459_v0 }
 0x7b8   :  { %5373 = vmatmul.mubr.f32.vlgmr.msra.gmra.mxu0 %v4071_v12  ;;  %5380 = vmatprep.subr.mxu0 %v5459_v0 }
 0x7b9   :  { %5382 = vmatprep.mubr.msk.f32.mxu0 %vm5460_vm0, %v5459_v0  ;;  %5385 = vmatprep.subr.mxu1 %v5459_v0 }
 0x7ba   :  { %5378 = vmatmul.mubr.f32.vlgmr.msra.gmra.mxu1 %v4071_v12 }
 0x7bb   :  { %5387 = vmatprep.mubr.msk.f32.mxu1 %vm5460_vm0, %v5459_v0 }
 0x870   :  { %v4112_v17 = vpop.f32.mrf.mxu0 }
 0x871   :  { %v4188_v18 = vpop.f32.mrf.mxu1 }
 0x872   :  { %v4189_v19 = vadd.f32 %v4188_v18, %v4112_v17  ;;  %v5354_v20 = vpop.f32.mrf.mxu0 }
 0x873   :  { %v5359_v21 = vpop.f32.mrf.mxu1 }
 0x874   :  { %v4262_v22 = vpop.f32.mrf.mxu0 }
 0x875   :  { %v4263_v23 = vadd.f32 %v4262_v22, %v4189_v19 }
 0x876   :  { %v4336_v24 = vpop.f32.mrf.mxu1  ;;  %v5364_v25 = vpop.f32.mrf.mxu0 }
 0x877   :  { %v4337_v26 = vadd.f32 %v4336_v24, %v4263_v23 }
 0x878   :  { %v5369_v27 = vpop.f32.mrf.mxu1  ;;  %v4410_v28 = vpop.f32.mrf.mxu0 }
 0x879   :  { %v4411_v29 = vadd.f32 %v4410_v28, %v4337_v26 }
 0x87a   :  { %v4482_v30 = vpop.f32.mrf.mxu1  ;;  %v5374_v31 = vpop.f32.mrf.mxu0 }
 0x87b   :  { %v4483_v32 = vadd.f32 %v4482_v30, %v4411_v29 }
 0x87c   :  { %v5379_v33 = vpop.f32.mrf.mxu1 }
 0x87d   :  { %v4517_v34 = vand.u32 4294901760, %v4483_v32 }
 0x87f   :  { %v4553_v35 = vsub.f32 %v4483_v32, %v4517_v34  ;;  %5381 = vmatpush3.msra.mxu0 %v4517_v34 }
 0x880   :  { %5390 = vmatprep.subr.mxu0 %v5459_v0 }
 0x881   :  { %v4554_v36 = vand.u32 4294901760, %v4553_v35 }
 0x883   :  { %v4555_v37 = vsub.f32 %v4553_v35, %v4554_v36 }
 0x885   :  { %v4556_v38 = vand.u32 4294901760, %v4555_v37 }
 0x887   :  { %5383 = vmatmul.mubr.f32.vlgmr.msra.gmra.mxu0 %v4556_v38  ;;  %5386 = vmatpush3.msra.mxu1 %v4556_v38 }
 0x888   :  { %5391 = vmatpush3.msra.mxu0 %v4553_v35  ;;  %5388 = vmatmul.mubr.f32.vlgmr.msra.gmra.mxu1 %v4517_v34 }
 0x889   :  { %5395 = vmatprep.subr.mxu1 %v5459_v0  ;;  %5392 = vmatprep.mubr.msk.f32.mxu0 %vm5460_vm0, %v5459_v0 }
 0x88a   :  { %5396 = vmatpush3.msra.mxu1 %v4517_v34  ;;  %5400 = vmatprep.subr.mxu0 %v5459_v0 }
 0x88b   :  { %5393 = vmatmul.mubr.f32.vlgmr.msra.gmra.mxu0 %v4553_v35  ;;  %5397 = vmatprep.mubr.msk.f32.mxu1 %vm5460_vm0, %v5459_v0 }
 0x88c   :  { %5401 = vmatpush3.msra.mxu0 %v4554_v36  ;;  %5405 = vmatprep.subr.mxu1 %v5459_v0 }
 0x88d   :  { %5398 = vmatmul.mubr.f32.vlgmr.msra.gmra.mxu1 %v4554_v36  ;;  %5402 = vmatprep.mubr.msk.f32.mxu0 %vm5460_vm0, %v5459_v0 }
 0x88e   :  { %5406 = vmatpush3.msra.mxu1 %v4517_v34  ;;  %5407 = vmatprep.mubr.msk.f32.mxu1 %vm5460_vm0, %v5459_v0 }
 0x88f   :  { %5403 = vmatmul.mubr.f32.vlgmr.msra.gmra.mxu0 %v4517_v34 }
 0x891   :  { %5408 = vmatmul.mubr.f32.vlgmr.msra.gmra.mxu1 %v4517_v34 }
 0x947   :  { %v4558_v39 = vpop.f32.mrf.mxu0 }
 0x948   :  { %v4634_v40 = vpop.f32.mrf.mxu1 }
 0x949   :  { %v4635_v41 = vadd.f32 %v4634_v40, %v4558_v39  ;;  %v5384_v42 = vpop.f32.mrf.mxu0 }
 0x94a   :  { %v5389_v43 = vpop.f32.mrf.mxu1 }
 0x94b   :  { %v4708_v44 = vpop.f32.mrf.mxu0 }
 0x94c   :  { %v4709_v45 = vadd.f32 %v4708_v44, %v4635_v41 }
 0x94d   :  { %v4782_v46 = vpop.f32.mrf.mxu1  ;;  %v5394_v47 = vpop.f32.mrf.mxu0 }
 0x94e   :  { %v4783_v48 = vadd.f32 %v4782_v46, %v4709_v45 }
 0x94f   :  { %v5399_v49 = vpop.f32.mrf.mxu1  ;;  %v4856_v50 = vpop.f32.mrf.mxu0 }
 0x950   :  { %v4857_v51 = vadd.f32 %v4856_v50, %v4783_v48 }
 0x951   :  { %v4928_v52 = vpop.f32.mrf.mxu1  ;;  %v5404_v53 = vpop.f32.mrf.mxu0 }
 0x952   :  { %v4929_v0 = vadd.f32 %v4928_v52, %v4857_v51 }
 0x953   :  { %v5409_v54 = vpop.f32.mrf.mxu1 }
 0x954   :  { %4932 = vst.msk [vmem:[#allocation6] sm:$0x1f] %vm23_vm1, %v4929_v0 }
 0x955   :  { %5445 = shalt.err (!%p5442_p9)
}
 0x956   :  { %4942 = dma.vmem_to_hbm [thread:$0]  %s4940_s11, 128, %s5680_s1, [#allocation5]  }
 0x957   :  { %5456 = dma.done.wait [#allocation5], 128  }
 0x958   :  { %5457 = vsyncadd [#allocation5], 4294967168 }
 0x959   :  { %4946 = vsyncpa [#allocation4], 1 }
 0x95a   :  { %4947 = vsyncpa [#allocation5], 1 }

</bundles_post_ra>
